<compile_context>
chip_gen: v7x
topology: tpu7x:2x2x1
jax: 0.10.0
libtpu: 0.0.40
codegen_flags: <defaults>
</compile_context>

<pallas_src>
import functools

import jax
import jax.numpy as jnp
from jax.experimental import pallas as pl
from jax.experimental.pallas import tpu as pltpu


def _final_layer_kernel(mod_ref, x_ref, w_ref, b_ref, out_ref, *, eps):
    """One (batch b, sequence-tile n) grid step.

    mod_ref : (2, H)   row 0 = shift, row 1 = 1 + scale   (per batch, f32)
    x_ref   : (tN, H)  sequence tile of batch b
    w_ref   : (H, D)   final-linear weight (resident across the grid)
    b_ref   : (1, D)   final-linear bias
    out_ref : (tN, D)
    """
    x = x_ref[...].astype(jnp.float32)

    # LayerNorm (no affine, eps=1e-6): single-pass stats, var = E[x^2] - mean^2.
    inv_h = 1.0 / x.shape[-1]
    mean = jnp.sum(x, axis=-1, keepdims=True) * inv_h
    mean_sq = jnp.sum(x * x, axis=-1, keepdims=True) * inv_h
    var = mean_sq - mean * mean
    xn = (x - mean) * jax.lax.rsqrt(var + eps)

    # modulate: x * (1 + scale) + shift  (broadcast over the sequence rows).
    shift = mod_ref[0:1, :].astype(jnp.float32)
    scale1 = mod_ref[1:2, :].astype(jnp.float32)
    xm = xn * scale1 + shift

    # Final linear on the MXU in the streamed weight dtype, f32 accumulation.
    y = jnp.dot(xm.astype(w_ref.dtype), w_ref[...],
                preferred_element_type=jnp.float32)
    y = y + b_ref[...].astype(jnp.float32)
    out_ref[...] = y.astype(out_ref.dtype)


def _pick_seq_tile(n, batch, target=512):
    """Sequence tile: a multiple-of-8 divisor of n (or n itself, the full dim).

    Prefers the largest tile <= target that still leaves an even, >=4-step grid
    (keeps both v7x TensorCores busy); if no multiple-of-8 divisor exists the
    only legal block is the full dim, which satisfies the (8,128) rule exactly.
    """
    divs = [t for t in range(8, n + 1, 8) if n % t == 0]
    if not divs:
        return n
    cand = sorted([t for t in divs if t <= target] or [min(divs)], reverse=True)

    def steps(t):
        return batch * (n // t)

    for t in cand:                       # even and >= 4 total steps, biggest tile
        if steps(t) >= 4 and steps(t) % 2 == 0:
            return t
    for t in cand:                       # >= 4 total steps, biggest tile
        if steps(t) >= 4:
            return t
    return cand[-1]                      # can't reach 4 steps: maximize step count


def _vmem_limit_bytes(tn, h, d, x_itemsize, w_itemsize, out_itemsize):
    """Right-size the VMEM limit from the real double-buffered tile footprint."""
    x_buf = 2 * tn * h * x_itemsize            # double-buffered x tile
    out_buf = 2 * tn * d * out_itemsize        # double-buffered output tile
    w_buf = 2 * h * d * w_itemsize             # resident final-linear weight
    small = 2 * (2 * h * 4 + d * 4)            # mod rows + bias
    work = 2 * tn * h * 4                      # f32 LN / modulate intermediates
    limit = int(1.5 * (x_buf + out_buf + w_buf + small + work)) + (4 << 20)
    return max(16 << 20, min(limit, 64 << 20))


def final_layer_forward(x, c, w_ada, b_ada, w_lin, b_lin, *,
                        eps=1e-6, seq_tile=512, stream_dtype=None):
    """FinalLayer forward.  Weights stored (in, out): y = x @ W + b.

    stream_dtype: optional dtype (e.g. jnp.bfloat16) for the HBM-streamed tensors
    (x, w_lin, output).  The kernel is read-bound on x, so bf16 streaming ~halves
    wall-clock for f32 inputs; LN/modulate math and matmul accumulation stay f32.
    Default None keeps the caller's dtypes (bit-for-bit comparable to f32 ref).
    """
    B, N, H = x.shape
    out_dim = w_lin.shape[1]

    if stream_dtype is not None:
        x = x.astype(stream_dtype)
        w_lin = w_lin.astype(stream_dtype)

    # --- adaLN modulation hoisted out of the kernel (tiny (B,H)@(H,2H) matmul) ---
    cf = c.astype(jnp.float32)
    silu_c = cf * jax.nn.sigmoid(cf)
    mod = silu_c @ w_ada.astype(jnp.float32) + b_ada.astype(jnp.float32)   # (B, 2H)
    # Fuse shift and (1 + scale) into one (B, 2, H) slab -> one tiny DMA per step.
    mod_rows = jnp.stack([mod[:, :H], 1.0 + mod[:, H:]], axis=1)           # (B, 2, H)

    b_row = b_lin.reshape(1, out_dim)

    # --- tiling: big sequence tiles, but keep an even >=4-step grid when possible ---
    tN = _pick_seq_tile(N, B, seq_tile)
    grid = (B, N // tN)

    vmem_limit = _vmem_limit_bytes(tN, H, out_dim, x.dtype.itemsize,
                                   w_lin.dtype.itemsize, x.dtype.itemsize)

    kernel = functools.partial(_final_layer_kernel, eps=eps)

    return pl.pallas_call(
        kernel,
        out_shape=jax.ShapeDtypeStruct((B, N, out_dim), x.dtype),
        grid=grid,
        in_specs=[
            pl.BlockSpec((None, 2, H), lambda b, n: (b, 0, 0)),     # [shift ; 1+scale]
            pl.BlockSpec((None, tN, H), lambda b, n: (b, n, 0)),    # x tile
            pl.BlockSpec((H, out_dim), lambda b, n: (0, 0)),        # final weight
            pl.BlockSpec((1, out_dim), lambda b, n: (0, 0)),        # final bias
        ],
        # True-width output (no 128-lane padding, no wrapper slice copy).
        out_specs=pl.BlockSpec((None, tN, out_dim), lambda b, n: (b, n, 0)),
        compiler_params=pltpu.CompilerParams(
            dimension_semantics=("parallel", "parallel"),
            vmem_limit_bytes=vmem_limit,
        ),
    )(mod_rows, x, w_lin, b_row)


def final_layer_reference(x, c, w_ada, b_ada, w_lin, b_lin, *, eps=1e-6):
    # Pure-JAX reference mirroring the PyTorch forward.
    silu_c = c * jax.nn.sigmoid(c)
    mod = silu_c @ w_ada + b_ada
    H = x.shape[-1]
    shift, scale = mod[:, :H], mod[:, H:]
    mean = jnp.mean(x, axis=-1, keepdims=True)
    var = jnp.mean((x - mean) ** 2, axis=-1, keepdims=True)
    xn = (x - mean) * jax.lax.rsqrt(var + eps)
    xm = xn * (1 + scale[:, None, :]) + shift[:, None, :]
    return xm @ w_lin + b_lin


if __name__ == "__main__":
    # Small, forward-consistent shapes.
    B, N, H = 2, 8, 32          # batch, num patches (seq), hidden_size
    patch_size, out_channels = 2, 4
    out_dim = patch_size * patch_size * out_channels  # 16

    key = jax.random.PRNGKey(0)
    kx, kc, kwa, kba, kwl, kbl = jax.random.split(key, 6)

    x = jax.random.normal(kx, (B, N, H), dtype=jnp.float32)
    c = jax.random.normal(kc, (B, H), dtype=jnp.float32)

    # Parameters stored as (in, out) so the kernel does x @ W + b
    # (PyTorch nn.Linear stores W as (out, in)).
    w_ada = jax.random.normal(kwa, (H, 2 * H), dtype=jnp.float32) * 0.02
    b_ada = jax.random.normal(kba, (2 * H,), dtype=jnp.float32) * 0.02
    w_lin = jax.random.normal(kwl, (H, out_dim), dtype=jnp.float32) * 0.02
    b_lin = jax.random.normal(kbl, (out_dim,), dtype=jnp.float32) * 0.02

    ref = final_layer_reference(x, c, w_ada, b_ada, w_lin, b_lin)

    # 1) exact-dtype (f32) path: tight tolerance vs the pure-JAX reference.
    out = jax.block_until_ready(final_layer_forward(x, c, w_ada, b_ada, w_lin, b_lin))
    assert out.shape == (B, N, out_dim)
    assert jnp.allclose(out, ref, atol=1e-4, rtol=1e-4), "f32 kernel mismatch vs reference"

    # 2) bf16-streamed path (x / w_lin / output bf16; LN + accumulation stay f32).
    out_bf16 = jax.block_until_ready(
        final_layer_forward(x, c, w_ada, b_ada, w_lin, b_lin, stream_dtype=jnp.bfloat16))
    assert out_bf16.dtype == jnp.bfloat16
    assert jnp.allclose(out_bf16.astype(jnp.float32), ref, atol=3e-2, rtol=3e-2), \
        "bf16-streamed kernel diverged from reference"

    # 3) sequence length with no multiple-of-8 divisor exercises the full-dim
    #    fallback tile (fixes the old tile-picker correctness concern).
    x_odd = jax.random.normal(kx, (1, 12, H), dtype=jnp.float32)
    c_odd = jax.random.normal(kc, (1, H), dtype=jnp.float32)
    out_odd = jax.block_until_ready(
        final_layer_forward(x_odd, c_odd, w_ada, b_ada, w_lin, b_lin))
    ref_odd = final_layer_reference(x_odd, c_odd, w_ada, b_ada, w_lin, b_lin)
    assert jnp.allclose(out_odd, ref_odd, atol=1e-4, rtol=1e-4), "odd-N kernel mismatch"

    print("KERNEL_OK")
</pallas_src>

<mosaic_0001>
module attributes {stable_mosaic.version = 11 : i64} {
  func.func @_final_layer_kernel(%arg0: i32, %arg1: i32, %arg2: memref<1x2x32xf32, #tpu.memory_space<vmem>>, %arg3: memref<1x8x32xf32, #tpu.memory_space<vmem>>, %arg4: memref<32x16xf32, #tpu.memory_space<vmem>>, %arg5: memref<1x16xf32, #tpu.memory_space<vmem>>, %arg6: memref<1x8x16xf32, #tpu.memory_space<vmem>>) attributes {dimension_semantics = [#tpu.dimension_semantics<parallel>, #tpu.dimension_semantics<parallel>], iteration_bounds = array<i64: 2, 1>, scalar_prefetch = 0 : i64, scratch_operands = 0 : i64, tpu.core_type = #tpu.core_type<tc>, window_params = [{transform_indices = @transform_0, window_bounds = array<i64: 1, 2, 32>}, {transform_indices = @transform_1, window_bounds = array<i64: 1, 8, 32>}, {pipeline_mode = #tpu.pipeline_mode<synchronous>, transform_indices = @transform_2, window_bounds = array<i64: 32, 16>}, {pipeline_mode = #tpu.pipeline_mode<synchronous>, transform_indices = @transform_3, window_bounds = array<i64: 1, 16>}, {transform_indices = @transform_4, window_bounds = array<i64: 1, 8, 16>}]} {
    %c0 = arith.constant 0 : index
    %c0_0 = arith.constant 0 : index
    %c0_1 = arith.constant 0 : index
    %0 = vector.load %arg3[%c0, %c0_0, %c0_1] : memref<1x8x32xf32, #tpu.memory_space<vmem>>, vector<1x8x32xf32>
    %1 = vector.shape_cast %0 : vector<1x8x32xf32> to vector<8x32xf32>
    %cst = arith.constant dense<0.000000e+00> : vector<8xf32>
    %2 = vector.multi_reduction <add>, %1, %cst [1] : vector<8x32xf32> to vector<8xf32>
    %3 = vector.shape_cast %2 : vector<8xf32> to vector<8x1xf32>
    %cst_2 = arith.constant 3.125000e-02 : f32
    %4 = vector.broadcast %cst_2 : f32 to vector<8x1xf32>
    %5 = arith.mulf %3, %4 : vector<8x1xf32>
    %6 = arith.mulf %1, %1 : vector<8x32xf32>
    %cst_3 = arith.constant dense<0.000000e+00> : vector<8xf32>
    %7 = vector.multi_reduction <add>, %6, %cst_3 [1] : vector<8x32xf32> to vector<8xf32>
    %8 = vector.shape_cast %7 : vector<8xf32> to vector<8x1xf32>
    %cst_4 = arith.constant 3.125000e-02 : f32
    %9 = vector.broadcast %cst_4 : f32 to vector<8x1xf32>
    %10 = arith.mulf %8, %9 : vector<8x1xf32>
    %11 = arith.mulf %5, %5 : vector<8x1xf32>
    %12 = arith.subf %10, %11 : vector<8x1xf32>
    %13 = vector.broadcast %5 : vector<8x1xf32> to vector<8x32xf32>
    %14 = arith.subf %1, %13 : vector<8x32xf32>
    %cst_5 = arith.constant 9.99999997E-7 : f32
    %15 = vector.broadcast %cst_5 : f32 to vector<8x1xf32>
    %16 = arith.addf %12, %15 : vector<8x1xf32>
    %17 = math.rsqrt %16 : vector<8x1xf32>
    %18 = vector.broadcast %17 : vector<8x1xf32> to vector<8x32xf32>
    %19 = arith.mulf %14, %18 : vector<8x32xf32>
    %c0_6 = arith.constant 0 : index
    %c0_7 = arith.constant 0 : index
    %c0_8 = arith.constant 0 : index
    %20 = vector.load %arg2[%c0_6, %c0_7, %c0_8] : memref<1x2x32xf32, #tpu.memory_space<vmem>>, vector<1x1x32xf32>
    %21 = vector.shape_cast %20 : vector<1x1x32xf32> to vector<1x32xf32>
    %c0_9 = arith.constant 0 : index
    %c1 = arith.constant 1 : index
    %c0_10 = arith.constant 0 : index
    %22 = vector.load %arg2[%c0_9, %c1, %c0_10] : memref<1x2x32xf32, #tpu.memory_space<vmem>>, vector<1x1x32xf32>
    %23 = vector.shape_cast %22 : vector<1x1x32xf32> to vector<1x32xf32>
    %24 = vector.broadcast %23 : vector<1x32xf32> to vector<8x32xf32>
    %25 = arith.mulf %19, %24 : vector<8x32xf32>
    %26 = vector.broadcast %21 : vector<1x32xf32> to vector<8x32xf32>
    %27 = arith.addf %25, %26 : vector<8x32xf32>
    %c0_11 = arith.constant 0 : index
    %c0_12 = arith.constant 0 : index
    %28 = vector.load %arg4[%c0_11, %c0_12] : memref<32x16xf32, #tpu.memory_space<vmem>>, vector<32x16xf32>
    %cst_13 = arith.constant dense<0.000000e+00> : vector<8x16xf32>
    %29 = tpu.matmul %27, %28, %cst_13 {dimension_numbers = #tpu.dot_dimension_numbers<[1], [0], [0], [1], [0, 0, 1, 1], [], []>} : vector<8x32xf32>, vector<32x16xf32>, vector<8x16xf32> -> vector<8x16xf32>
    %c0_14 = arith.constant 0 : index
    %c0_15 = arith.constant 0 : index
    %30 = vector.load %arg5[%c0_14, %c0_15] : memref<1x16xf32, #tpu.memory_space<vmem>>, vector<1x16xf32>
    %31 = vector.broadcast %30 : vector<1x16xf32> to vector<8x16xf32>
    %32 = arith.addf %29, %31 : vector<8x16xf32>
    %c0_16 = arith.constant 0 : index
    %c0_17 = arith.constant 0 : index
    %c0_18 = arith.constant 0 : index
    %33 = vector.load %arg6[%c0_16, %c0_17, %c0_18] : memref<1x8x16xf32, #tpu.memory_space<vmem>>, vector<1x8x16xf32>
    %34 = vector.shape_cast %33 : vector<1x8x16xf32> to vector<8x16xf32>
    %35 = vector.shape_cast %32 : vector<8x16xf32> to vector<1x8x16xf32>
    tpu.vector_store %arg6[%c0_16, %c0_17, %c0_18], %35 {strides = array<i32>} : memref<1x8x16xf32, #tpu.memory_space<vmem>>, vector<1x8x16xf32>,
    return
  }
  func.func @transform_0(%arg0: i32, %arg1: i32) -> (i32, i32, i32) {
    %c0_i32 = arith.constant 0 : i32
    %c0_i32_0 = arith.constant 0 : i32
    %c0_i32_1 = arith.constant 0 : i32
    return %arg0, %c0_i32, %c0_i32_0 : i32, i32, i32
  }
  func.func @transform_1(%arg0: i32, %arg1: i32) -> (i32, i32, i32) {
    %c0_i32 = arith.constant 0 : i32
    %c0_i32_0 = arith.constant 0 : i32
    return %arg0, %arg1, %c0_i32 : i32, i32, i32
  }
  func.func @transform_2(%arg0: i32, %arg1: i32) -> (i32, i32) {
    %c0_i32 = arith.constant 0 : i32
    %c0_i32_0 = arith.constant 0 : i32
    %c0_i32_1 = arith.constant 0 : i32
    return %c0_i32, %c0_i32_0 : i32, i32
  }
  func.func @transform_3(%arg0: i32, %arg1: i32) -> (i32, i32) {
    %c0_i32 = arith.constant 0 : i32
    %c0_i32_0 = arith.constant 0 : i32
    %c0_i32_1 = arith.constant 0 : i32
    return %c0_i32, %c0_i32_0 : i32, i32
  }
  func.func @transform_4(%arg0: i32, %arg1: i32) -> (i32, i32, i32) {
    %c0_i32 = arith.constant 0 : i32
    %c0_i32_0 = arith.constant 0 : i32
    return %arg0, %arg1, %c0_i32 : i32, i32, i32
  }
}

</mosaic_0001>

<bundles_post_ra>
// kernel: tpu_custom_call.1
= control target key start
LH: loop header
LB: loop body
LE: loop exit
PB: predicated region body
PF: predicated region fallthrough
CT: control target
= control target key end

     0   :  { %9 = vsyncpa [#allocation3], 0  ;;  %s792_s0 = inlined_call_operand.vmem [shape: f32[2,2,32], index: 0, kind: input, shape index: {}]   ;;  %s793_s1 = inlined_call_operand.vmem [shape: f32[2,8,32], index: 1, kind: input, shape index: {}]   ;;  %s794_s2 = inlined_call_operand.vmem [shape: f32[32,16], index: 2, kind: input, shape index: {}]   ;;  %s795_s3 = inlined_call_operand.vmem [shape: f32[1,16], index: 3, kind: input, shape index: {}]   ;;  %s796_s4 = inlined_call_operand.hbm [shape: f32[2,8,16], index: 4, kind: output, shape index: {}]  }
   0x1   :  { %11 = vsyncpa [#allocation3 + $0x1], 0  ;;  %s655_s15 = smov 0   ;;  %s657_s16 = smov 0  }
   0x2   :  { %s659_s17 = smov 0   ;;  %s661_s18 = smov 0  }
   0x3   :  { %s663_s19 = smov 0   ;;  %s665_s20 = smov 0  }
   0x4 LB: > { %s448_s21 = sadd.s32 4294967295, %s624_s20   ;;  %s449_s22 = sadd.s32 4294967294, %s624_s20   ;;  %s624_s20 = sphi %s665_s20, %s17_s20   ;;  %s620_s19 = sphi %s663_s19, %s803_s19   ;;  %s616_s18 = sphi %s661_s18, %s802_s18   ;;  %s612_s17 = sphi %s659_s17, %s801_s17   ;;  %s608_s16 = sphi %s657_s16, %s800_s16   ;;  %s604_s15 = sphi %s655_s15, %s799_s15  }
   0x5   : > { %s29_s23 = sadd.s32 1, %s620_s19  ;;  %s134_s24 = sadd.s32 1, %s612_s17 }
   0x6   : > { %p31_p0 = scmp.ge.s32.totalorder %s29_s23, 2  ;;  %p144_p1 = scmp.ne.s32.totalorder %s612_s17, %s608_s16 }
   0x7   : > { %p145_p2 = scmp.eq.s32.totalorder %s448_s21, 1  ;;  %p150_p3 = scmp.ne.s32.totalorder %s608_s16, %s604_s15 }
   0x8   : > { %s805_s23 = smov (%p31_p0, %s29_s23), 0  ;;  %p151_p5 = scmp.eq.s32.totalorder %s449_s22, 1 }
   0x9   : > { %p695_p4 = por %p145_p2, %p144_p1  ;;  %s129_s26 = ssub.s32 %s620_s19, %s805_s23 }
   0xa   : > { %p452_p6 = scmp.ge.s32.totalorder %s624_s20, 1  ;;  %p132_p7 = scmp.eq.s32.totalorder %s129_s26, 0 }
   0xb   : > { %p702_p8 = por %p151_p5, %p150_p3  ;;  %p192_p9 = scmp.lt.s32.totalorder %s624_s20, 3 }
   0xc   : > { %s708_s28 = scalar_select %p132_p7, %s612_s17, %s134_s24  }
   0xd   : > { %p193_p10 = pnand %p452_p6, %p192_p9 }
   0xe   : > { %p224_p11 = scmp.lt.s32.totalorder (!%p193_p10), %s616_s18, 1  ;;  %vm236_vm0 = vcmask (!%p193_p10), 261120   ;;  %v264_v4 = vld [vmem:[%s794_s2] sm:$0xff] (!%p193_p10)  ;;  %v265_v5 = vld [vmem:[%s794_s2 + $0x8] sm:$0xff] (!%p193_p10)  ;;  %v266_v6 = vld [vmem:[%s794_s2 + $0x10] sm:$0xff] (!%p193_p10)  ;;  %v626_v7 = vmov (!%p193_p10), 0.0|0.0  }
   0xf   : > { %196 = sbr.rel (%p193_p10) target bundleno = 425 (0x1a9), region = 36  ;;  %480 = vmatprep.subr.bf16.mxu0 (!%p193_p10), %v626_v7  ;;  %v481_v8 = vpack.c.bf16 (!%p193_p10), %v265_v5, %v264_v4  ;;  %v267_v9 = vld [vmem:[%s794_s2 + $0x18] sm:$0xff] (!%p193_p10)  ;;  %vm627_vm1 = vmmov (!%p193_p10), 0   ;;  %v628_v10 = vmov (!%p193_p10), 0.0   ;;  %s221_s5 = sand.u32 (!%p193_p10), 1, %s608_s16   ;;  %vm348_vm2 = vcmask (!%p193_p10), 130048  }
  0x10   : > { %477 = vmatprep.mubr.msk.f32.mxu0 (!%p193_p10), %vm627_vm1, %v628_v10  ;;  %v484_v11 = vpack.c.bf16 (!%p193_p10), %v267_v9, %v266_v6  ;;  %s453_s6 = sshll.u32 (!%p193_p10), %s221_s5, 3  ;;  %v458_v26 = vld [vmem:[%s795_s3] ss:$0 sm:$0xff] (!%p193_p10)  ;;  %s351_s14 = scalar_lea.sflag (!%p193_p10), [#allocation3], %s221_s5 }
  0x11   : > { %482 = vmatpush3.bf16.msra.mxu0 (!%p193_p10), %v481_v8  ;;  %s223_s9 = scalar_lea.vmem (!%p193_p10), [#allocation2], %s453_s6 }
  0x12   : > { %483 = vmatprep.subr.bf16.mxu0 (!%p193_p10), %v626_v7  ;;  %s365_s10 = sshll.u32 (!%p193_p10), %s223_s9, 4  ;;  %s747_s10 = int_to_ptr.vmem [resolvable:$true] %s365_s10 }
  0x13   : > { %s546_s21 = scalar_lea.vmem (!%p193_p10), %s747_s10, 128 }
  0x14   : > { %p547_p12 = scmp.ne.s32.totalorder (!%p193_p10), %s747_s10, %s546_s21 }
  0x15   : > { %485 = vmatpush3.bf16.msra.mxu0 (!%p193_p10), %v484_v11 }
  0x16   : > { %s712_s29 = scalar_select %p224_p11, %s616_s18, 1 }
  0x17   : > { %p548_p13 = pnand %p547_p12, %p695_p4 }
  0x18   : > { %s455_s30 = sshll.u32 %s712_s29, 3  ;;  %s454_s22 = sshll.u32 %s712_s29, 1 }
  0x19   : > { %s234_s7 = scalar_lea.vmem %s793_s1, %s455_s30  ;;  %s227_s30 = scalar_lea.vmem %s792_s0, %s454_s22 }
  0x1a   : > { %v235_v0 = vld [vmem:[%s234_s7] sm:$0xff]  ;;  %s461_s29 = sshll.u32 %s616_s18, 7  ;;  %p549_p0 = pneg %p548_p13 }
  0x1b   : > { %v237_v1 = vsel %vm236_vm0, %v235_v0, 0.0  ;;  %v241_v2 = vmul.f32 %v235_v0, %v235_v0  ;;  %v456_v21 = vld [vmem:[%s227_s30 + $0x1] ss:$0 sm:$0xff]  ;;  %v457_v23 = vld [vmem:[%s227_s30] ss:$0 sm:$0xff]  ;;  %s745_s13 = scalar_lea.hbm %s796_s4, %s461_s29  ;;  %s629_s18 = smov [#allocation2]  }
  0x1c   : > { %238 = vadd.xlane.f32.xlu0 %v237_v1  ;;  %s550_s22 = sshll.u32 %s629_s18, 4  ;;  %s551_s22 = int_to_ptr.vmem [resolvable:$false] %s550_s22 }
  0x1d   : > { %v242_v3 = vsel %vm236_vm0, %v241_v2, 0.0  ;;  %s552_s24 = scalar_lea.vmem %s551_s22, 256  ;;  %p553_p1 = scmp.lt.s32.totalorder %s747_s10, %s551_s22 }
  0x1e   : > { %p554_p2 = scmp.lt.s32.totalorder %s552_s24, %s546_s21 }
  0x20   : > { %243 = vadd.xlane.f32.xlu0 %v242_v3  ;;  %p555_p3 = por %p554_p2, %p553_p1 }
  0x22   : > { %p556_p5 = pnand %p555_p3, %p549_p0 }
  0xa9   : > { %v239_v12 = vpop.xlane.xlu0 %238 }
  0xaa   : > { %v240_v13 = vmul.f32 0.03125, %v239_v12 }
  0xac   : > { %v246_v15 = vmul.f32 %v240_v13, %v240_v13  ;;  %v248_v19 = vsub.f32 %v235_v0, %v240_v13 }
  0xad   : > { %v244_v14 = vpop.xlane.xlu0 %243 }
  0xae   : > { %v245_v16 = vmul.f32 0.03125, %v244_v14 }
  0xb0   : > { %v247_v17 = vsub.f32 %v245_v16, %v246_v15 }
  0xb2   : > { %v249_v18 = vadd.f32 1e-06, %v247_v17 }
  0xb4   : > { %544 = vrsqrt.f32 %v249_v18 }
  0xbe   : > { %v545_v20 = vpop.eup %544 }
  0xbf   : > { %v251_v22 = vmul.f32 %v545_v20, %v248_v19 }
  0xc1   : > { %v258_v24 = vmul.f32 %v456_v21, %v251_v22 }
  0xc3   : > { %v263_v25 = vadd.f32 %v457_v23, %v258_v24 }
  0xc5   : > { %478 = vmatmul.mubr.msk.f32.vlgmr.msra.gmra.mrb[0].mxu0 %vm236_vm0, %v263_v25 }
 0x198   : > { %v344_v27 = vpop.f32.mrb[0].mxu0 }
 0x199   : > { %v345_v28 = vadd.f32 %v458_v26, %v344_v27  ;;  %v479_v29 = vpop.f32.mrb[1].mxu0 }
 0x19b   : > { %349 = vst.msk [vmem:[%s223_s9] sm:$0xff] %vm348_vm2, %v345_v28 }
 0x19c   : > { %559 = shalt.err (!%p556_p5)
}
 0x19d   : > { %s560_s26 = scalar_lea.hbm %s745_s13, 128  ;;  %s564_s6 = scalar_lea.hbm %s796_s4, 256 }
 0x19e   : > { %p561_p6 = scmp.ne.s32.totalorder %s745_s13, %s560_s26  ;;  %p565_p10 = scmp.lt.u32.totalorder %s745_s13, %s796_s4 }
 0x19f   : > { %p566_p11 = scmp.lt.u32.totalorder %s564_s6, %s560_s26  ;;  %p568_p13 = scmp.lt.u32.totalorder %s560_s26, %s745_s13 }
 0x1a0   : > { %p562_p7 = pnand %p561_p6, %p695_p4 }
 0x1a1   : > { %p567_p12 = por %p566_p11, %p565_p10 }
 0x1a2   : > { %p563_p9 = pneg %p562_p7 }
 0x1a3   : > { %p569_p0 = por %p568_p13, %p567_p12 }
 0x1a5   : > { %p570_p1 = pnand %p569_p0, %p563_p9 }
 0x1a7   : > { %573 = shalt.err (!%p570_p1)
}
 0x1a8   : > { %486 = dma.vmem_to_hbm [thread:$0]  (%p695_p4), %s747_s10, 128, %s745_s13, %s351_s14  }
 0x1a9 PF: > { %p492_p2 = scmp.ge.s32.totalorder %s624_s20, 2  ;;  %s377_s29 = sand.u32 1, %s604_s15  }
 0x1aa   : > { %s378_s9 = scalar_lea.sflag [#allocation3], %s377_s29 }
 0x1ab   : > { %p489_p3 = pnand %p492_p2, %p702_p8 }
 0x1ad   : > { %599 = dma.done.wait (!%p489_p3), %s378_s9, 128  }
 0x1ae   : > { %601 = vsyncadd (!%p489_p3), %s378_s9, 4294967168  ;;  %s17_s20 = sadd.s32 1, %s624_s20   ;;  %s799_s15 = smov %s608_s16 }
 0x1af   : > { %p14_p5 = scmp.ge.s32.totalorder %s17_s20, 4   ;;  %s800_s16 = smov %s612_s17 }
 0x1b0   : > { %s801_s17 = smov %s708_s28  ;;  %s802_s18 = smov %s620_s19 }
 0x1b1   : > { %s803_s19 = smov %s805_s23  ;;  %16 = sbr.rel (!%p14_p5) target bundleno = 4 (0x4), region = 74 }
 0x1b8   :  { %383 = vsyncpa [#allocation3], 1 }
 0x1b9   :  { %385 = vsyncpa [#allocation3 + $0x1], 1 }

</bundles_post_ra>
